<compile_context>
chip_gen: v7x
topology: tpu7x:2x2x1
jax: 0.10.0
libtpu: 0.0.40
codegen_flags: <defaults>
</compile_context>

<pallas_src>
import jax
import jax.numpy as jnp
import numpy as np
from jax.experimental import pallas as pl
from jax.experimental.pallas import tpu as pltpu


# ----------------------------- module constants -----------------------------

def _dct_mat(size):
    m = [[(np.sqrt(1.0 / size) if i == 0 else np.sqrt(2.0 / size))
          * np.cos((j + 0.5) * np.pi * i / size)
          for j in range(size)] for i in range(size)]
    return jnp.asarray(m, dtype=jnp.float32)


def _generate_filter(start, end, size):
    return jnp.asarray(
        [[0.0 if (i + j > end or i + j <= start) else 1.0 for j in range(size)]
         for i in range(size)],
        dtype=jnp.float32,
    )


def combine_filter(base, learnable=None, *, use_learnable=True, norm=False):
    """Fold Filter.forward into a single [S, S] multiplier (hoisted out of the
    kernel). The norm path uses a traced jnp.sum -> no host sync under jit."""
    filt = base
    if use_learnable and learnable is not None:
        filt = filt + (2.0 * jax.nn.sigmoid(learnable) - 1.0)   # norm_sigma
    if norm:
        filt = filt / jnp.sum(base)
    return filt


# --------------------------------- kernel -----------------------------------

def _bmm(a3, b3):
    # Batched matmul with the batch dim on BOTH operands (Mosaic-friendly).
    return jnp.einsum("bij,bjk->bik", a3, b3, preferred_element_type=jnp.float32)


def _fad_head_kernel(x_ref, d_ref, dt_ref, filt_ref, o_ref):
    # x_ref:    (TB, S, S)   block of flattened N*C slabs
    # d_ref:    (S, S)       DCT matrix D
    # dt_ref:   (S, S)       D^T
    # filt_ref: (4, S, S)    pre-combined filters (base + 2*sigmoid(w) - 1)
    # o_ref:    (4, TB, S, S)
    tb, s, _ = x_ref.shape
    d = d_ref[...]
    dt = dt_ref[...]
    flat = (s % 8) == 0   # sublane-aligned -> the (TB*S, S) flatten is free

    # Broadcasts hoisted out of the 4-filter loop (JAX does not CSE them).
    d_b = jnp.broadcast_to(d[None], (tb, s, s))
    dt_b = jnp.broadcast_to(dt[None], (tb, s, s))

    def right_mul(a3, m2, m_b):
        # Per-slab A[b] @ M. Lane-dense single 2-D matmul when S is 8-aligned,
        # otherwise a batched matmul (no relayout either way).
        if flat:
            return jnp.dot(a3.reshape(tb * s, s), m2,
                           preferred_element_type=jnp.float32).reshape(tb, s, s)
        return _bmm(a3, m_b)

    x = x_ref[...]
    # x_freq = D @ X @ D^T   (right-mult first, then batched left-mult by D)
    x_freq = _bmm(d_b, right_mul(x, dt, dt_b))

    for i in range(4):
        x_pass = x_freq * filt_ref[i]                 # (S, S) bcast over TB
        # y_i = D^T @ x_pass @ D
        y = _bmm(dt_b, right_mul(x_pass, d, d_b))
        o_ref[i] = y.astype(o_ref.dtype)


# -------------------------------- wrappers -----------------------------------

def _pick_block_b(B, S, target_block_bytes=2 * 1024 * 1024):
    # Cap the input block at ~2 MiB: the output block carries 4 filtered copies,
    # so 2x in + 2x out double-buffered blocks plus intermediates stay well
    # inside v7x's 64 MiB VMEM while still amortizing per-grid-step overhead.
    tb = max(1, target_block_bytes // (S * S * 4))
    return int(min(B, tb))


def fad_head_forward(x, dct, dct_t, filters):
    """Pallas FAD_Head forward.

    x: [N, C, S, S] f32, dct/dct_t: [S, S], filters: [4, S, S] pre-combined.
    Returns [N, 4*C, S, S] (torch.cat(y_list, dim=1) ordering).
    """
    N, C, S, S2 = x.shape
    assert S == S2, "FAD_Head expects square spatial dims"
    B = N * C
    xb = x.reshape(B, S, S)

    TB = _pick_block_b(B, S)
    grid = (pl.cdiv(B, TB),)

    block_in = TB * S * S * 4
    block_out = 4 * TB * S * S * 4
    vmem_limit = int(min(64 * 2**20, max(32 * 2**20, 4 * (block_in + block_out))))

    cost = pl.CostEstimate(
        flops=20 * B * S**3 + 8 * B * S * S,          # 10 SxS matmuls / slab
        transcendentals=0,                             # sigmoid hoisted out
        bytes_accessed=4 * (5 * B * S * S + 6 * S * S),
    )

    out = pl.pallas_call(
        _fad_head_kernel,
        out_shape=jax.ShapeDtypeStruct((4, B, S, S), x.dtype),
        grid=grid,
        in_specs=[
            pl.BlockSpec((TB, S, S), lambda b: (b, 0, 0)),
            pl.BlockSpec((S, S), lambda b: (0, 0)),
            pl.BlockSpec((S, S), lambda b: (0, 0)),
            pl.BlockSpec((4, S, S), lambda b: (0, 0, 0)),
        ],
        out_specs=pl.BlockSpec((4, TB, S, S), lambda b: (0, b, 0, 0)),
        compiler_params=pltpu.CompilerParams(
            dimension_semantics=("parallel",),
            vmem_limit_bytes=vmem_limit,
        ),
        cost_estimate=cost,
    )(xb, dct, dct_t, filters)

    # (4, N*C, S, S) -> (N, 4*C, S, S), matching torch.cat(y_list, dim=1).
    out = out.reshape(4, N, C, S, S)
    return jnp.transpose(out, (1, 0, 2, 3, 4)).reshape(N, 4 * C, S, S)


def fad_head_apply(x, dct, dct_t, bases, learnables):
    # Filter.forward hoisted to the wrapper (sigmoid computed once, not per step).
    filters = jnp.stack([combine_filter(bases[i], learnables[i]) for i in range(4)])
    return fad_head_forward(x, dct, dct_t, filters)


def fad_head_ref(x, dct, dct_t, bases, learnables):
    """Pure-JAX reference matching the PyTorch FAD_Head forward."""
    hp = jax.lax.Precision.HIGHEST
    x_freq = jnp.einsum("ij,ncjk->ncik", dct, x, precision=hp)
    x_freq = jnp.einsum("ncik,kl->ncil", x_freq, dct_t, precision=hp)
    ys = []
    for i in range(4):
        filt = bases[i] + (2.0 * jax.nn.sigmoid(learnables[i]) - 1.0)
        xp = x_freq * filt
        y = jnp.einsum("ij,ncjk->ncik", dct_t, xp, precision=hp)
        y = jnp.einsum("ncik,kl->ncil", y, dct, precision=hp)
        ys.append(y)
    return jnp.concatenate(ys, axis=1)


# ----------------------------------- main ------------------------------------

if __name__ == "__main__":
    N, C, size = 2, 4, 16
    key = jax.random.PRNGKey(0)
    kx, kl = jax.random.split(key)
    x = jax.random.normal(kx, (N, C, size, size), dtype=jnp.float32)

    dct = _dct_mat(size)
    dct_t = dct.T
    # FAD_Head bands: low [0, s/16], middle [s/16, s/8], high [s/8, s], all [0, 2s].
    bands = [(0, size // 16), (size // 16, size // 8), (size // 8, size), (0, size * 2)]
    bases = jnp.stack([_generate_filter(bs, be, size) for (bs, be) in bands])
    # learnable ~ N(0, 0.1), as in self.learnable.data.normal_(0.0, 0.1)
    learnables = 0.1 * jax.random.normal(kl, (4, size, size), dtype=jnp.float32)

    y = fad_head_apply(x, dct, dct_t, bases, learnables)
    y = jax.block_until_ready(y)

    y_ref = fad_head_ref(x, dct, dct_t, bases, learnables)
    assert y.shape == (N, 4 * C, size, size)
    err = float(jnp.max(jnp.abs(y - y_ref)))
    assert jnp.allclose(y, y_ref, atol=1e-3, rtol=1e-3), f"max abs err = {err}"

    print("KERNEL_OK")
</pallas_src>

<mosaic_0001>
module attributes {stable_mosaic.version = 11 : i64} {
  func.func @_fad_head_kernel(%arg0: i32, %arg1: memref<8x16x16xf32, #tpu.memory_space<vmem>>, %arg2: memref<16x16xf32, #tpu.memory_space<vmem>>, %arg3: memref<16x16xf32, #tpu.memory_space<vmem>>, %arg4: memref<4x16x16xf32, #tpu.memory_space<vmem>>, %arg5: memref<4x8x16x16xf32, #tpu.memory_space<vmem>>) attributes {dimension_semantics = [#tpu.dimension_semantics<parallel>], iteration_bounds = array<i64: 1>, scalar_prefetch = 0 : i64, scratch_operands = 0 : i64, tpu.core_type = #tpu.core_type<tc>, window_params = [{transform_indices = @transform_0, window_bounds = array<i64: 8, 16, 16>}, {pipeline_mode = #tpu.pipeline_mode<synchronous>, transform_indices = @transform_1, window_bounds = array<i64: 16, 16>}, {pipeline_mode = #tpu.pipeline_mode<synchronous>, transform_indices = @transform_2, window_bounds = array<i64: 16, 16>}, {pipeline_mode = #tpu.pipeline_mode<synchronous>, transform_indices = @transform_3, window_bounds = array<i64: 4, 16, 16>}, {transform_indices = @transform_4, window_bounds = array<i64: 4, 8, 16, 16>}]} {
    %c0 = arith.constant 0 : index
    %c0_0 = arith.constant 0 : index
    %0 = vector.load %arg2[%c0, %c0_0] : memref<16x16xf32, #tpu.memory_space<vmem>>, vector<16x16xf32>
    %c0_1 = arith.constant 0 : index
    %c0_2 = arith.constant 0 : index
    %1 = vector.load %arg3[%c0_1, %c0_2] : memref<16x16xf32, #tpu.memory_space<vmem>>, vector<16x16xf32>
    %2 = vector.shape_cast %0 : vector<16x16xf32> to vector<1x16x16xf32>
    %3 = vector.shape_cast %2 : vector<1x16x16xf32> to vector<1x16x16xf32>
    %4 = vector.broadcast %3 : vector<1x16x16xf32> to vector<8x16x16xf32>
    %5 = vector.shape_cast %1 : vector<16x16xf32> to vector<1x16x16xf32>
    %6 = vector.shape_cast %5 : vector<1x16x16xf32> to vector<1x16x16xf32>
    %7 = vector.broadcast %6 : vector<1x16x16xf32> to vector<8x16x16xf32>
    %c0_3 = arith.constant 0 : index
    %c0_4 = arith.constant 0 : index
    %c0_5 = arith.constant 0 : index
    %8 = vector.load %arg1[%c0_3, %c0_4, %c0_5] : memref<8x16x16xf32, #tpu.memory_space<vmem>>, vector<8x16x16xf32>
    %9 = vector.shape_cast %8 : vector<8x16x16xf32> to vector<128x16xf32>
    %cst = arith.constant dense<0.000000e+00> : vector<128x16xf32>
    %10 = tpu.matmul %9, %1, %cst {dimension_numbers = #tpu.dot_dimension_numbers<[1], [0], [0], [1], [0, 0, 1, 1], [], []>} : vector<128x16xf32>, vector<16x16xf32>, vector<128x16xf32> -> vector<128x16xf32>
    %11 = vector.shape_cast %10 : vector<128x16xf32> to vector<8x16x16xf32>
    "tpu.trace_start"() <{level = 10 : i32, message = "bij,bjk->bik"}> : () -> ()
    %cst_6 = arith.constant dense<0.000000e+00> : vector<8x16x16xf32>
    %12 = tpu.matmul %4, %11, %cst_6 {dimension_numbers = #tpu.dot_dimension_numbers<[2], [1], [1], [2], [0, 0, 0, 1, 1, 2], [0], [0]>} : vector<8x16x16xf32>, vector<8x16x16xf32>, vector<8x16x16xf32> -> vector<8x16x16xf32>
    "tpu.trace_stop"() : () -> ()
    %c0_7 = arith.constant 0 : index
    %c0_8 = arith.constant 0 : index
    %c0_9 = arith.constant 0 : index
    %13 = vector.load %arg4[%c0_7, %c0_8, %c0_9] : memref<4x16x16xf32, #tpu.memory_space<vmem>>, vector<1x16x16xf32>
    %14 = vector.shape_cast %13 : vector<1x16x16xf32> to vector<16x16xf32>
    %15 = vector.shape_cast %14 : vector<16x16xf32> to vector<1x16x16xf32>
    %16 = vector.broadcast %15 : vector<1x16x16xf32> to vector<8x16x16xf32>
    %17 = arith.mulf %12, %16 : vector<8x16x16xf32>
    %18 = vector.shape_cast %17 : vector<8x16x16xf32> to vector<128x16xf32>
    %cst_10 = arith.constant dense<0.000000e+00> : vector<128x16xf32>
    %19 = tpu.matmul %18, %0, %cst_10 {dimension_numbers = #tpu.dot_dimension_numbers<[1], [0], [0], [1], [0, 0, 1, 1], [], []>} : vector<128x16xf32>, vector<16x16xf32>, vector<128x16xf32> -> vector<128x16xf32>
    %20 = vector.shape_cast %19 : vector<128x16xf32> to vector<8x16x16xf32>
    "tpu.trace_start"() <{level = 10 : i32, message = "bij,bjk->bik"}> : () -> ()
    %cst_11 = arith.constant dense<0.000000e+00> : vector<8x16x16xf32>
    %21 = tpu.matmul %7, %20, %cst_11 {dimension_numbers = #tpu.dot_dimension_numbers<[2], [1], [1], [2], [0, 0, 0, 1, 1, 2], [0], [0]>} : vector<8x16x16xf32>, vector<8x16x16xf32>, vector<8x16x16xf32> -> vector<8x16x16xf32>
    "tpu.trace_stop"() : () -> ()
    %c0_12 = arith.constant 0 : index
    %c0_13 = arith.constant 0 : index
    %c0_14 = arith.constant 0 : index
    %c0_15 = arith.constant 0 : index
    %22 = vector.load %arg5[%c0_12, %c0_13, %c0_14, %c0_15] : memref<4x8x16x16xf32, #tpu.memory_space<vmem>>, vector<1x8x16x16xf32>
    %23 = vector.shape_cast %22 : vector<1x8x16x16xf32> to vector<8x16x16xf32>
    %24 = vector.shape_cast %21 : vector<8x16x16xf32> to vector<1x8x16x16xf32>
    tpu.vector_store %arg5[%c0_12, %c0_13, %c0_14, %c0_15], %24 {strides = array<i32>} : memref<4x8x16x16xf32, #tpu.memory_space<vmem>>, vector<1x8x16x16xf32>,
    %c1 = arith.constant 1 : index
    %c0_16 = arith.constant 0 : index
    %c0_17 = arith.constant 0 : index
    %25 = vector.load %arg4[%c1, %c0_16, %c0_17] : memref<4x16x16xf32, #tpu.memory_space<vmem>>, vector<1x16x16xf32>
    %26 = vector.shape_cast %25 : vector<1x16x16xf32> to vector<16x16xf32>
    %27 = vector.shape_cast %26 : vector<16x16xf32> to vector<1x16x16xf32>
    %28 = vector.broadcast %27 : vector<1x16x16xf32> to vector<8x16x16xf32>
    %29 = arith.mulf %12, %28 : vector<8x16x16xf32>
    %30 = vector.shape_cast %29 : vector<8x16x16xf32> to vector<128x16xf32>
    %cst_18 = arith.constant dense<0.000000e+00> : vector<128x16xf32>
    %31 = tpu.matmul %30, %0, %cst_18 {dimension_numbers = #tpu.dot_dimension_numbers<[1], [0], [0], [1], [0, 0, 1, 1], [], []>} : vector<128x16xf32>, vector<16x16xf32>, vector<128x16xf32> -> vector<128x16xf32>
    %32 = vector.shape_cast %31 : vector<128x16xf32> to vector<8x16x16xf32>
    "tpu.trace_start"() <{level = 10 : i32, message = "bij,bjk->bik"}> : () -> ()
    %cst_19 = arith.constant dense<0.000000e+00> : vector<8x16x16xf32>
    %33 = tpu.matmul %7, %32, %cst_19 {dimension_numbers = #tpu.dot_dimension_numbers<[2], [1], [1], [2], [0, 0, 0, 1, 1, 2], [0], [0]>} : vector<8x16x16xf32>, vector<8x16x16xf32>, vector<8x16x16xf32> -> vector<8x16x16xf32>
    "tpu.trace_stop"() : () -> ()
    %c1_20 = arith.constant 1 : index
    %c0_21 = arith.constant 0 : index
    %c0_22 = arith.constant 0 : index
    %c0_23 = arith.constant 0 : index
    %34 = vector.load %arg5[%c1_20, %c0_21, %c0_22, %c0_23] : memref<4x8x16x16xf32, #tpu.memory_space<vmem>>, vector<1x8x16x16xf32>
    %35 = vector.shape_cast %34 : vector<1x8x16x16xf32> to vector<8x16x16xf32>
    %36 = vector.shape_cast %33 : vector<8x16x16xf32> to vector<1x8x16x16xf32>
    tpu.vector_store %arg5[%c1_20, %c0_21, %c0_22, %c0_23], %36 {strides = array<i32>} : memref<4x8x16x16xf32, #tpu.memory_space<vmem>>, vector<1x8x16x16xf32>,
    %c2 = arith.constant 2 : index
    %c0_24 = arith.constant 0 : index
    %c0_25 = arith.constant 0 : index
    %37 = vector.load %arg4[%c2, %c0_24, %c0_25] : memref<4x16x16xf32, #tpu.memory_space<vmem>>, vector<1x16x16xf32>
    %38 = vector.shape_cast %37 : vector<1x16x16xf32> to vector<16x16xf32>
    %39 = vector.shape_cast %38 : vector<16x16xf32> to vector<1x16x16xf32>
    %40 = vector.broadcast %39 : vector<1x16x16xf32> to vector<8x16x16xf32>
    %41 = arith.mulf %12, %40 : vector<8x16x16xf32>
    %42 = vector.shape_cast %41 : vector<8x16x16xf32> to vector<128x16xf32>
    %cst_26 = arith.constant dense<0.000000e+00> : vector<128x16xf32>
    %43 = tpu.matmul %42, %0, %cst_26 {dimension_numbers = #tpu.dot_dimension_numbers<[1], [0], [0], [1], [0, 0, 1, 1], [], []>} : vector<128x16xf32>, vector<16x16xf32>, vector<128x16xf32> -> vector<128x16xf32>
    %44 = vector.shape_cast %43 : vector<128x16xf32> to vector<8x16x16xf32>
    "tpu.trace_start"() <{level = 10 : i32, message = "bij,bjk->bik"}> : () -> ()
    %cst_27 = arith.constant dense<0.000000e+00> : vector<8x16x16xf32>
    %45 = tpu.matmul %7, %44, %cst_27 {dimension_numbers = #tpu.dot_dimension_numbers<[2], [1], [1], [2], [0, 0, 0, 1, 1, 2], [0], [0]>} : vector<8x16x16xf32>, vector<8x16x16xf32>, vector<8x16x16xf32> -> vector<8x16x16xf32>
    "tpu.trace_stop"() : () -> ()
    %c2_28 = arith.constant 2 : index
    %c0_29 = arith.constant 0 : index
    %c0_30 = arith.constant 0 : index
    %c0_31 = arith.constant 0 : index
    %46 = vector.load %arg5[%c2_28, %c0_29, %c0_30, %c0_31] : memref<4x8x16x16xf32, #tpu.memory_space<vmem>>, vector<1x8x16x16xf32>
    %47 = vector.shape_cast %46 : vector<1x8x16x16xf32> to vector<8x16x16xf32>
    %48 = vector.shape_cast %45 : vector<8x16x16xf32> to vector<1x8x16x16xf32>
    tpu.vector_store %arg5[%c2_28, %c0_29, %c0_30, %c0_31], %48 {strides = array<i32>} : memref<4x8x16x16xf32, #tpu.memory_space<vmem>>, vector<1x8x16x16xf32>,
    %c3 = arith.constant 3 : index
    %c0_32 = arith.constant 0 : index
    %c0_33 = arith.constant 0 : index
    %49 = vector.load %arg4[%c3, %c0_32, %c0_33] : memref<4x16x16xf32, #tpu.memory_space<vmem>>, vector<1x16x16xf32>
    %50 = vector.shape_cast %49 : vector<1x16x16xf32> to vector<16x16xf32>
    %51 = vector.shape_cast %50 : vector<16x16xf32> to vector<1x16x16xf32>
    %52 = vector.broadcast %51 : vector<1x16x16xf32> to vector<8x16x16xf32>
    %53 = arith.mulf %12, %52 : vector<8x16x16xf32>
    %54 = vector.shape_cast %53 : vector<8x16x16xf32> to vector<128x16xf32>
    %cst_34 = arith.constant dense<0.000000e+00> : vector<128x16xf32>
    %55 = tpu.matmul %54, %0, %cst_34 {dimension_numbers = #tpu.dot_dimension_numbers<[1], [0], [0], [1], [0, 0, 1, 1], [], []>} : vector<128x16xf32>, vector<16x16xf32>, vector<128x16xf32> -> vector<128x16xf32>
    %56 = vector.shape_cast %55 : vector<128x16xf32> to vector<8x16x16xf32>
    "tpu.trace_start"() <{level = 10 : i32, message = "bij,bjk->bik"}> : () -> ()
    %cst_35 = arith.constant dense<0.000000e+00> : vector<8x16x16xf32>
    %57 = tpu.matmul %7, %56, %cst_35 {dimension_numbers = #tpu.dot_dimension_numbers<[2], [1], [1], [2], [0, 0, 0, 1, 1, 2], [0], [0]>} : vector<8x16x16xf32>, vector<8x16x16xf32>, vector<8x16x16xf32> -> vector<8x16x16xf32>
    "tpu.trace_stop"() : () -> ()
    %c3_36 = arith.constant 3 : index
    %c0_37 = arith.constant 0 : index
    %c0_38 = arith.constant 0 : index
    %c0_39 = arith.constant 0 : index
    %58 = vector.load %arg5[%c3_36, %c0_37, %c0_38, %c0_39] : memref<4x8x16x16xf32, #tpu.memory_space<vmem>>, vector<1x8x16x16xf32>
    %59 = vector.shape_cast %58 : vector<1x8x16x16xf32> to vector<8x16x16xf32>
    %60 = vector.shape_cast %57 : vector<8x16x16xf32> to vector<1x8x16x16xf32>
    tpu.vector_store %arg5[%c3_36, %c0_37, %c0_38, %c0_39], %60 {strides = array<i32>} : memref<4x8x16x16xf32, #tpu.memory_space<vmem>>, vector<1x8x16x16xf32>,
    return
  }
  func.func @transform_0(%arg0: i32) -> (i32, i32, i32) {
    %c0_i32 = arith.constant 0 : i32
    %c0_i32_0 = arith.constant 0 : i32
    %c0_i32_1 = arith.constant 0 : i32
    return %arg0, %c0_i32, %c0_i32_0 : i32, i32, i32
  }
  func.func @transform_1(%arg0: i32) -> (i32, i32) {
    %c0_i32 = arith.constant 0 : i32
    %c0_i32_0 = arith.constant 0 : i32
    %c0_i32_1 = arith.constant 0 : i32
    return %c0_i32, %c0_i32_0 : i32, i32
  }
  func.func @transform_2(%arg0: i32) -> (i32, i32) {
    %c0_i32 = arith.constant 0 : i32
    %c0_i32_0 = arith.constant 0 : i32
    %c0_i32_1 = arith.constant 0 : i32
    return %c0_i32, %c0_i32_0 : i32, i32
  }
  func.func @transform_3(%arg0: i32) -> (i32, i32, i32) {
    %c0_i32 = arith.constant 0 : i32
    %c0_i32_0 = arith.constant 0 : i32
    %c0_i32_1 = arith.constant 0 : i32
    %c0_i32_2 = arith.constant 0 : i32
    return %c0_i32, %c0_i32_0, %c0_i32_1 : i32, i32, i32
  }
  func.func @transform_4(%arg0: i32) -> (i32, i32, i32, i32) {
    %c0_i32 = arith.constant 0 : i32
    %c0_i32_0 = arith.constant 0 : i32
    %c0_i32_1 = arith.constant 0 : i32
    %c0_i32_2 = arith.constant 0 : i32
    return %c0_i32, %arg0, %c0_i32_0, %c0_i32_1 : i32, i32, i32, i32
  }
}

</mosaic_0001>

<bundles_post_ra>
// kernel: tpu_custom_call.1
= control target key start
LH: loop header
LB: loop body
LE: loop exit
PB: predicated region body
PF: predicated region fallthrough
CT: control target
= control target key end

     0   :  { %9 = vsyncpa [#allocation3], 0  ;;  %s5888_s0 = inlined_call_operand.hbm [shape: f32[8,16,16], index: 0, kind: input, shape index: {}]   ;;  %s5889_s1 = inlined_call_operand.hbm [shape: f32[16,16], index: 1, kind: input, shape index: {}]   ;;  %s5890_s2 = inlined_call_operand.hbm [shape: f32[16,16], index: 2, kind: input, shape index: {}]   ;;  %s5891_s3 = inlined_call_operand.hbm [shape: f32[4,16,16], index: 3, kind: input, shape index: {}]   ;;  %s5892_s4 = inlined_call_operand.hbm [shape: f32[4,8,16,16], index: 4, kind: output, shape index: {}]  }
   0x1   :  { %10 = vsyncpa [#allocation6], 0 }
   0x2   :  { %11 = vsyncpa [#allocation9], 0 }
   0x3   :  { %12 = vsyncpa [#allocation4], 0  ;;  %s5367_s15 = smov [#allocation5]   ;;  %s5368_s17 = smov [#allocation2]  }
   0x4   :  { %s30_s16 = sshll.u32 %s5367_s15, 4  ;;  %s18_s18 = sshll.u32 %s5368_s17, 4  ;;  %s31_s16 = int_to_ptr.vmem [resolvable:$true] %s30_s16  ;;  %s5399_s18 = int_to_ptr.vmem [resolvable:$true] %s18_s18 }
   0x5   :  { %s5249_s21 = scalar_lea.hbm %s5889_s1, 256 }
   0x6   :  { %p5250_p0 = scmp.ne.s32.totalorder %s5889_s1, %s5249_s21  ;;  %p5253_p1 = scmp.lt.u32.totalorder %s5249_s21, %s5889_s1 }
   0x8   :  { %p5255_p2 = pnand %p5253_p1, %p5250_p0 }
   0xa   :  { %5258 = shalt.err (!%p5255_p2)
}
   0xb   :  { %s5259_s26 = scalar_lea.vmem %s31_s16, 256  ;;  %p5264_p4 = scmp.lt.s32.totalorder %s31_s16, %s31_s16 }
   0xc   :  { %p5260_p3 = scmp.ne.s32.totalorder %s31_s16, %s5259_s26  ;;  %p5265_p5 = scmp.lt.s32.totalorder %s5259_s26, %s5259_s26 }
   0xe   :  { %p5266_p6 = por %p5265_p5, %p5264_p4 }
  0x10   :  { %p5267_p7 = pnand %p5266_p6, %p5260_p3 }
  0x12   :  { %5270 = shalt.err (!%p5267_p7)
}
  0x13   :  { %s5369_s27 = smov 128   ;;  %s5370_s28 = smov 8  }
  0x14   :  { %36 = dma.hbm_to_vmem [thread:$0]  %s5889_s1, 256, %s31_s16, [#allocation6], %s5369_s27, %s5369_s27, %s5370_s28  }
  0x15   :  { %s5271_s7 = scalar_lea.hbm %s5888_s0, 2048 }
  0x16   :  { %p5272_p8 = scmp.ne.s32.totalorder %s5888_s0, %s5271_s7  ;;  %p5275_p9 = scmp.lt.u32.totalorder %s5271_s7, %s5888_s0 }
  0x18   :  { %p5277_p10 = pnand %p5275_p9, %p5272_p8 }
  0x1a   :  { %5280 = shalt.err (!%p5277_p10)
}
  0x1b   :  { %s5281_s12 = scalar_lea.vmem %s5399_s18, 2048  ;;  %p5286_p12 = scmp.lt.s32.totalorder %s5399_s18, %s5399_s18 }
  0x1c   :  { %p5282_p11 = scmp.ne.s32.totalorder %s5399_s18, %s5281_s12  ;;  %p5287_p13 = scmp.lt.s32.totalorder %s5281_s12, %s5281_s12 }
  0x1e   :  { %p5288_p0 = por %p5287_p13, %p5286_p12 }
  0x20   :  { %p5289_p1 = pnand %p5288_p0, %p5282_p11 }
  0x22   :  { %5292 = shalt.err (!%p5289_p1)
}
  0x23   :  { %24 = dma.hbm_to_vmem [thread:$0]  %s5888_s0, 2048, %s5399_s18, [#allocation3], %s5369_s27, %s5369_s27, %s5370_s28  }
  0x24   :  { %s5371_s14 = smov [#allocation7]   ;;  %s5372_s16 = smov [#allocation8]  }
  0x25   :  { %s42_s15 = sshll.u32 %s5371_s14, 4  ;;  %s54_s17 = sshll.u32 %s5372_s16, 4  ;;  %s43_s15 = int_to_ptr.vmem [resolvable:$true] %s42_s15  ;;  %s5436_s17 = int_to_ptr.vmem [resolvable:$true] %s54_s17 }
  0x26   :  { %s5293_s21 = scalar_lea.hbm %s5890_s2, 256 }
  0x27   :  { %p5294_p2 = scmp.ne.s32.totalorder %s5890_s2, %s5293_s21  ;;  %p5297_p3 = scmp.lt.u32.totalorder %s5293_s21, %s5890_s2 }
  0x29   :  { %p5299_p4 = pnand %p5297_p3, %p5294_p2 }
  0x2b   :  { %5302 = shalt.err (!%p5299_p4)
}
  0x2c   :  { %s5303_s0 = scalar_lea.vmem %s43_s15, 256  ;;  %p5308_p6 = scmp.lt.s32.totalorder %s43_s15, %s43_s15 }
  0x2d   :  { %p5304_p5 = scmp.ne.s32.totalorder %s43_s15, %s5303_s0  ;;  %p5309_p7 = scmp.lt.s32.totalorder %s5303_s0, %s5303_s0 }
  0x2f   :  { %p5310_p8 = por %p5309_p7, %p5308_p6 }
  0x31   :  { %p5311_p9 = pnand %p5310_p8, %p5304_p5 }
  0x33   :  { %5314 = shalt.err (!%p5311_p9)
}
  0x34   :  { %48 = dma.hbm_to_vmem [thread:$0]  %s5890_s2, 256, %s43_s15, [#allocation6], %s5369_s27, %s5369_s27, %s5370_s28  }
  0x35   :  { %s5315_s5 = scalar_lea.hbm %s5891_s3, 1024 }
  0x36   :  { %p5316_p10 = scmp.ne.s32.totalorder %s5891_s3, %s5315_s5  ;;  %p5319_p11 = scmp.lt.u32.totalorder %s5315_s5, %s5891_s3 }
  0x38   :  { %p5321_p12 = pnand %p5319_p11, %p5316_p10 }
  0x3a   :  { %5324 = shalt.err (!%p5321_p12)
}
  0x3b   :  { %s5325_s10 = scalar_lea.vmem %s5436_s17, 1024  ;;  %p5330_p0 = scmp.lt.s32.totalorder %s5436_s17, %s5436_s17 }
  0x3c   :  { %p5326_p13 = scmp.ne.s32.totalorder %s5436_s17, %s5325_s10  ;;  %p5331_p1 = scmp.lt.s32.totalorder %s5325_s10, %s5325_s10 }
  0x3e   :  { %p5332_p2 = por %p5331_p1, %p5330_p0 }
  0x40   :  { %p5333_p3 = pnand %p5332_p2, %p5326_p13 }
  0x42   :  { %5336 = shalt.err (!%p5333_p3)
}
  0x43   :  { %60 = dma.hbm_to_vmem [thread:$0]  %s5891_s3, 1024, %s5436_s17, [#allocation9], %s5369_s27, %s5369_s27, %s5370_s28  }
  0x44   :  { %5359 = dma.done.wait [#allocation3], 2048  }
  0x45   :  { %5360 = vsyncadd [#allocation3], 4294965248 }
  0x46   :  { %5361 = dma.done.wait [#allocation6], 512  }
  0x47   :  { %5362 = vsyncadd [#allocation6], 4294966784 }
  0x48   :  { %5363 = dma.done.wait [#allocation9], 1024  }
  0x49   :  { %5364 = vsyncadd [#allocation9], 4294966272  ;;  %vm93_vm0 = vcmask 130048   ;;  %v5473_v0 = vld [vmem:[#allocation7] sm:$0xff]  ;;  %v5475_v1 = vld [vmem:[#allocation7 + $0x8] sm:$0xff]  ;;  %s5373_s3 = smov [#allocation10]  }
  0x4a   :  { %v77_v2 = vld [vmem:[#allocation2] sm:$0xff]  ;;  %v5062_v3 = vpack.c.bf16 %v5475_v1, %v5473_v0  ;;  %v78_v4 = vld [vmem:[#allocation2 + $0x8] sm:$0xff]  ;;  %v79_v5 = vld [vmem:[#allocation2 + $0x10] sm:$0xff]  ;;  %s4218_s12 = sshll.u32 %s5373_s3, 4  ;;  %s4219_s12 = int_to_ptr.vmem [resolvable:$true] %s4218_s12 }
  0x4b   :  { %4646 = vmatprep.mubr.msk.f32.mxu0 %vm93_vm0, %v77_v2  ;;  %v80_v6 = vld [vmem:[#allocation2 + $0x18] sm:$0xff]  ;;  %v81_v7 = vld [vmem:[#allocation2 + $0x20] sm:$0xff]  ;;  %v82_v8 = vld [vmem:[#allocation2 + $0x28] sm:$0xff]  ;;  %s5337_s1 = scalar_lea.vmem %s4219_s12, 8192  ;;  %p5342_p5 = scmp.lt.s32.totalorder %s4219_s12, %s4219_s12 }
  0x4c   :  { %5063 = vmatprep.subr.bf16.mxu0 %v5062_v3  ;;  %v83_v9 = vld [vmem:[#allocation2 + $0x30] sm:$0xff]  ;;  %v84_v10 = vld [vmem:[#allocation2 + $0x38] sm:$0xff]  ;;  %v85_v11 = vld [vmem:[#allocation2 + $0x40] sm:$0xff]  ;;  %p5338_p4 = scmp.ne.s32.totalorder %s4219_s12, %s5337_s1  ;;  %p5343_p6 = scmp.lt.s32.totalorder %s5337_s1, %s5337_s1 }
  0x4d   :  { %5065 = vmatpush3.bf16.msra.mxu0 %v5062_v3  ;;  %v86_v12 = vld [vmem:[#allocation2 + $0x48] sm:$0xff]  ;;  %v87_v13 = vld [vmem:[#allocation2 + $0x50] sm:$0xff]  ;;  %v88_v14 = vld [vmem:[#allocation2 + $0x58] sm:$0xff] }
  0x4e   :  { %v89_v15 = vld [vmem:[#allocation2 + $0x60] sm:$0xff]  ;;  %v90_v16 = vld [vmem:[#allocation2 + $0x68] sm:$0xff]  ;;  %v91_v17 = vld [vmem:[#allocation2 + $0x70] sm:$0xff]  ;;  %p5344_p7 = por %p5343_p6, %p5342_p5 }
  0x4f   :  { %v92_v18 = vld [vmem:[#allocation2 + $0x78] sm:$0xff]  ;;  %v73_v19 = vld [vmem:[#allocation5] sm:$0xff]  ;;  %v74_v20 = vld [vmem:[#allocation5 + $0x8] sm:$0xff] }
  0x50   :  { %4647 = vmatmul.mubr.msk.f32.vlgmr.msra.gmra.mrb[0].mxu0 %vm93_vm0, %v78_v4  ;;  %4674 = vmatprep.mubr.msk.f32.mxu1 %vm93_vm0, %v73_v19  ;;  %v5496_v21 = vpack.c.bf16 %v74_v20, %v73_v19  ;;  %v893_v46 = vld [vmem:[#allocation8] sm:$0xff]  ;;  %v894_v48 = vld [vmem:[#allocation8 + $0x8] sm:$0xff]  ;;  %p5345_p8 = pnand %p5344_p7, %p5338_p4 }
  0x51   :  { %4649 = vmatprep.mubr.msk.f32.mxu0 %vm93_vm0, %v79_v5 }
  0x52   :  { %5099 = vmatprep.subr.bf16.mxu0 %v5496_v21 }
  0x53   :  { %5101 = vmatpush3.bf16.msra.mxu0 %v5496_v21 }
  0x54   :  { %4650 = vmatmul.mubr.msk.f32.gmra.mrb[2].mxu0 %vm93_vm0, %v80_v6  ;;  %5135 = vmatprep.subr.bf16.mxu0 %v5496_v21 }
  0x55   :  { %4652 = vmatprep.mubr.msk.f32.mxu0 %vm93_vm0, %v81_v7 }
  0x58   :  { %4653 = vmatmul.mubr.msk.f32.gmra.mrb[4].mxu0 %vm93_vm0, %v82_v8 }
  0x59   :  { %4655 = vmatprep.mubr.msk.f32.mxu0 %vm93_vm0, %v83_v9 }
  0x5c   :  { %4656 = vmatmul.mubr.msk.f32.gmra.mrb[6].mxu0 %vm93_vm0, %v84_v10 }
  0x5d   :  { %4658 = vmatprep.mubr.msk.f32.mxu0 %vm93_vm0, %v85_v11 }
  0x60   :  { %4659 = vmatmul.mubr.msk.f32.gmra.mrb[8].mxu0 %vm93_vm0, %v86_v12 }
  0x61   :  { %4661 = vmatprep.mubr.msk.f32.mxu0 %vm93_vm0, %v87_v13 }
  0x64   :  { %4662 = vmatmul.mubr.msk.f32.gmra.mrb[10].mxu0 %vm93_vm0, %v88_v14 }
  0x65   :  { %4664 = vmatprep.mubr.msk.f32.mxu0 %vm93_vm0, %v89_v15  ;;  %v1727_v15 = vld [vmem:[#allocation8 + $0x10] sm:$0xff] }
  0x68   :  { %4665 = vmatmul.mubr.msk.f32.gmra.mrb[12].mxu0 %vm93_vm0, %v90_v16 }
  0x69   :  { %4667 = vmatprep.mubr.msk.f32.mxu0 %vm93_vm0, %v91_v17 }
  0x6c   :  { %4668 = vmatmul.mubr.msk.f32.gmra.mrb[14].mxu0 %vm93_vm0, %v92_v18 }
 0x123   :  { %v4648_v22 = vpop.f32.mrb[0].mxu0 }
 0x124   :  { %v208_v23 = vpop.f32.mrb[1].mxu0 }
 0x125   :  { %v5066_v24 = vpack.c.bf16 %v4648_v22, %v208_v23 }
 0x127   :  { %v4651_v25 = vpop.f32.mrb[2].mxu0  ;;  %5067 = vmatprep.subr.bf16.mxu1 %v5066_v24 }
 0x128   :  { %v218_v26 = vpop.f32.mrb[3].mxu0  ;;  %5069 = vmatpush3.bf16.msra.mxu1 %v5066_v24 }
 0x129   :  { %v5070_v27 = vpack.c.bf16 %v4651_v25, %v218_v26 }
 0x12b   :  { %v4654_v28 = vpop.f32.mrb[4].mxu0  ;;  %4675 = vmatmul.mubr.msk.f32.vlgmr.msra.gmra.mrb[0].mxu1 %vm93_vm0, %v74_v20  ;;  %5071 = vmatprep.subr.bf16.mxu1 %v5070_v27 }
 0x12c   :  { %v228_v29 = vpop.f32.mrb[5].mxu0  ;;  %5073 = vmatpush3.bf16.msra.mxu1 %v5070_v27  ;;  %4681 = vmatprep.mubr.msk.f32.mxu1 %vm93_vm0, %v73_v19 }
 0x12d   :  { %v5074_v30 = vpack.c.bf16 %v4654_v28, %v228_v29 }
 0x12f   :  { %v4657_v31 = vpop.f32.mrb[6].mxu0  ;;  %4682 = vmatmul.mubr.msk.f32.vlgmr.msra.gmra.mrb[2].mxu1 %vm93_vm0, %v74_v20  ;;  %5075 = vmatprep.subr.bf16.mxu1 %v5074_v30 }
 0x130   :  { %v238_v32 = vpop.f32.mrb[7].mxu0  ;;  %5077 = vmatpush3.bf16.msra.mxu1 %v5074_v30  ;;  %4688 = vmatprep.mubr.msk.f32.mxu1 %vm93_vm0, %v73_v19 }
 0x131   :  { %v5078_v33 = vpack.c.bf16 %v4657_v31, %v238_v32 }
 0x133   :  { %v4660_v34 = vpop.f32.mrb[8].mxu0  ;;  %4689 = vmatmul.mubr.msk.f32.vlgmr.msra.gmra.mrb[4].mxu1 %vm93_vm0, %v74_v20  ;;  %5079 = vmatprep.subr.bf16.mxu1 %v5078_v33 }
 0x134   :  { %v248_v35 = vpop.f32.mrb[9].mxu0  ;;  %5081 = vmatpush3.bf16.msra.mxu1 %v5078_v33  ;;  %4695 = vmatprep.mubr.msk.f32.mxu1 %vm93_vm0, %v73_v19 }
 0x135   :  { %v5082_v36 = vpack.c.bf16 %v4660_v34, %v248_v35 }
 0x137   :  { %v4663_v37 = vpop.f32.mrb[10].mxu0  ;;  %4696 = vmatmul.mubr.msk.f32.vlgmr.msra.gmra.mrb[6].mxu1 %vm93_vm0, %v74_v20  ;;  %5083 = vmatprep.subr.bf16.mxu1 %v5082_v36 }
 0x138   :  { %v258_v38 = vpop.f32.mrb[11].mxu0  ;;  %5085 = vmatpush3.bf16.msra.mxu1 %v5082_v36  ;;  %4702 = vmatprep.mubr.msk.f32.mxu1 %vm93_vm0, %v73_v19  ;;  %v2556_v36 = vld [vmem:[#allocation8 + $0x20] sm:$0xff] }
 0x139   :  { %v5086_v39 = vpack.c.bf16 %v4663_v37, %v258_v38  ;;  %v2557_v38 = vld [vmem:[#allocation8 + $0x28] sm:$0xff] }
 0x13b   :  { %v4666_v40 = vpop.f32.mrb[12].mxu0  ;;  %4703 = vmatmul.mubr.msk.f32.vlgmr.msra.gmra.mrb[8].mxu1 %vm93_vm0, %v74_v20  ;;  %5087 = vmatprep.subr.bf16.mxu1 %v5086_v39 }
 0x13c   :  { %v268_v41 = vpop.f32.mrb[13].mxu0  ;;  %5089 = vmatpush3.bf16.msra.mxu1 %v5086_v39  ;;  %4709 = vmatprep.mubr.msk.f32.mxu1 %vm93_vm0, %v73_v19 }
 0x13d   :  { %v5090_v42 = vpack.c.bf16 %v4666_v40, %v268_v41 }
 0x13f   :  { %v4669_v43 = vpop.f32.mrb[14].mxu0  ;;  %4710 = vmatmul.mubr.msk.f32.vlgmr.msra.gmra.mrb[10].mxu1 %vm93_vm0, %v74_v20  ;;  %5091 = vmatprep.subr.bf16.mxu1 %v5090_v42 }
 0x140   :  { %v278_v44 = vpop.f32.mrb[15].mxu0  ;;  %5093 = vmatpush3.bf16.msra.mxu1 %v5090_v42  ;;  %4716 = vmatprep.mubr.msk.f32.mxu1 %vm93_vm0, %v73_v19 }
 0x141   :  { %v5094_v45 = vpack.c.bf16 %v4669_v43, %v278_v44 }
 0x143   :  { %4717 = vmatmul.mubr.msk.f32.vlgmr.msra.gmra.mrb[12].mxu1 %vm93_vm0, %v74_v20  ;;  %5095 = vmatprep.subr.bf16.mxu1 %v5094_v45 }
 0x144   :  { %5097 = vmatpush3.bf16.msra.mxu1 %v5094_v45  ;;  %4723 = vmatprep.mubr.msk.f32.mxu1 %vm93_vm0, %v73_v19  ;;  %v1728_v19 = vld [vmem:[#allocation8 + $0x18] sm:$0xff] }
 0x147   :  { %4724 = vmatmul.mubr.msk.f32.vlgmr.msra.gmra.mrb[14].mxu1 %vm93_vm0, %v74_v20 }
 0x148   :  { %4758 = vmatprep.mubr.msk.f32.mxu1 %vm93_vm0, %v5473_v0 }
 0x1fe   :  { %v5518_v47 = vpop.f32.mrb[0].mxu1 }
 0x1ff   :  { %v5520_v49 = vpop.f32.mrb[1].mxu1  ;;  %v896_v51 = vmul.f32 %v5518_v47, %v894_v48  ;;  %v1730_v22 = vmul.f32 %v5518_v47, %v1728_v19  ;;  %v2559_v40 = vmul.f32 %v5518_v47, %v2557_v38 }
 0x200   :  { %v895_v50 = vmul.f32 %v893_v46, %v5520_v49  ;;  %v1729_v20 = vmul.f32 %v1727_v15, %v5520_v49  ;;  %v2558_v39 = vmul.f32 %v2556_v36, %v5520_v49 }
 0x202   :  { %v5524_v52 = vpop.f32.mrb[2].mxu1  ;;  %4730 = vmatprep.mubr.msk.f32.mxu0 %vm93_vm0, %v895_v50 }
 0x203   :  { %v5527_v53 = vpop.f32.mrb[3].mxu1  ;;  %4731 = vmatmul.mubr.msk.f32.vlgmr.msra.gmra.mrb[16].mxu0 %vm93_vm0, %v896_v51  ;;  %v898_v55 = vmul.f32 %v5524_v52, %v894_v48  ;;  %v1732_v24 = vmul.f32 %v5524_v52, %v1728_v19  ;;  %v2561_v42 = vmul.f32 %v5524_v52, %v2557_v38 }
 0x204   :  { %v897_v54 = vmul.f32 %v893_v46, %v5527_v53  ;;  %5137 = vmatpush3.bf16.msra.mxu0 %v5496_v21  ;;  %v1731_v23 = vmul.f32 %v1727_v15, %v5527_v53  ;;  %v2560_v41 = vmul.f32 %v2556_v36, %v5527_v53 }
 0x205   :  { %5171 = vmatprep.subr.bf16.mxu0 %v5496_v21 }
 0x206   :  { %v5534_v56 = vpop.f32.mrb[4].mxu1  ;;  %4733 = vmatprep.mubr.msk.f32.mxu0 %vm93_vm0, %v897_v54 }
 0x207   :  { %v5537_v57 = vpop.f32.mrb[5].mxu1  ;;  %4734 = vmatmul.mubr.msk.f32.gmra.mrb[18].mxu0 %vm93_vm0, %v898_v55  ;;  %v900_v59 = vmul.f32 %v5534_v56, %v894_v48  ;;  %v1734_v26 = vmul.f32 %v5534_v56, %v1728_v19  ;;  %v2563_v44 = vmul.f32 %v5534_v56, %v2557_v38 }
 0x208   :  { %v899_v58 = vmul.f32 %v893_v46, %v5537_v57  ;;  %v1733_v25 = vmul.f32 %v1727_v15, %v5537_v57  ;;  %v2562_v43 = vmul.f32 %v2556_v36, %v5537_v57 }
 0x20a   :  { %v5542_v60 = vpop.f32.mrb[6].mxu1  ;;  %4736 = vmatprep.mubr.msk.f32.mxu0 %vm93_vm0, %v899_v58 }
 0x20b   :  { %v5545_v61 = vpop.f32.mrb[7].mxu1  ;;  %4737 = vmatmul.mubr.msk.f32.gmra.mrb[20].mxu0 %vm93_vm0, %v900_v59  ;;  %v902_v63 = vmul.f32 %v5542_v60, %v894_v48  ;;  %v1736_v28 = vmul.f32 %v5542_v60, %v1728_v19  ;;  %v3385_v59 = vld [vmem:[#allocation8 + $0x30] sm:$0xff] }
 0x20c   :  { %v901_v62 = vmul.f32 %v893_v46, %v5545_v61  ;;  %v1735_v27 = vmul.f32 %v1727_v15, %v5545_v61  ;;  %v2564_v45 = vmul.f32 %v2556_v36, %v5545_v61 }
 0x20e   :  { %v5550_v2 = vpop.f32.mrb[8].mxu1  ;;  %4739 = vmatprep.mubr.msk.f32.mxu0 %vm93_vm0, %v901_v62 }
 0x20f   :  { %v5553_v3 = vpop.f32.mrb[9].mxu1  ;;  %4740 = vmatmul.mubr.msk.f32.gmra.mrb[22].mxu0 %vm93_vm0, %v902_v63  ;;  %v904_v5 = vmul.f32 %v5550_v2, %v894_v48  ;;  %v1738_v30 = vmul.f32 %v5550_v2, %v1728_v19  ;;  %v3386_v63 = vld [vmem:[#allocation8 + $0x38] sm:$0xff] }
 0x210   :  { %v903_v4 = vmul.f32 %v893_v46, %v5553_v3  ;;  %v1737_v29 = vmul.f32 %v1727_v15, %v5553_v3 }
 0x212   :  { %v5558_v6 = vpop.f32.mrb[10].mxu1  ;;  %4742 = vmatprep.mubr.msk.f32.mxu0 %vm93_vm0, %v903_v4  ;;  %v3387_v4 = vmul.f32 %v3385_v59, %v5520_v49  ;;  %v3392_v49 = vmul.f32 %v5534_v56, %v3386_v63 }
 0x213   :  { %v5561_v7 = vpop.f32.mrb[11].mxu1  ;;  %4743 = vmatmul.mubr.msk.f32.gmra.mrb[24].mxu0 %vm93_vm0, %v904_v5  ;;  %v906_v9 = vmul.f32 %v5558_v6, %v894_v48  ;;  %v1740_v32 = vmul.f32 %v5558_v6, %v1728_v19  ;;  %v2569_v51 = vmul.f32 %v5558_v6, %v2557_v38  ;;  %v3388_v5 = vmul.f32 %v5518_v47, %v3386_v63 }
 0x214   :  { %v905_v8 = vmul.f32 %v893_v46, %v5561_v7  ;;  %v1739_v31 = vmul.f32 %v1727_v15, %v5561_v7  ;;  %v2568_v50 = vmul.f32 %v2556_v36, %v5561_v7  ;;  %v3394_v47 = vmul.f32 %v5542_v60, %v3386_v63 }
 0x215   :  { %v3398_v56 = vmul.f32 %v5558_v6, %v3386_v63 }
 0x216   :  { %v5566_v10 = vpop.f32.mrb[12].mxu1  ;;  %4745 = vmatprep.mubr.msk.f32.mxu0 %vm93_vm0, %v905_v8  ;;  %v3389_v8 = vmul.f32 %v3385_v59, %v5527_v53  ;;  %v3395_v53 = vmul.f32 %v3385_v59, %v5553_v3 }
 0x217   :  { %v5569_v11 = vpop.f32.mrb[13].mxu1  ;;  %4746 = vmatmul.mubr.msk.f32.gmra.mrb[26].mxu0 %vm93_vm0, %v906_v9  ;;  %v908_v13 = vmul.f32 %v5566_v10, %v894_v48  ;;  %v1742_v34 = vmul.f32 %v5566_v10, %v1728_v19  ;;  %v2571_v55 = vmul.f32 %v5566_v10, %v2557_v38  ;;  %v3390_v9 = vmul.f32 %v5524_v52, %v3386_v63 }
 0x218   :  { %v907_v12 = vmul.f32 %v893_v46, %v5569_v11  ;;  %v1741_v33 = vmul.f32 %v1727_v15, %v5569_v11  ;;  %v2570_v54 = vmul.f32 %v2556_v36, %v5569_v11  ;;  %v3396_v52 = vmul.f32 %v5550_v2, %v3386_v63 }
 0x21a   :  { %v5574_v14 = vpop.f32.mrb[14].mxu1  ;;  %4748 = vmatprep.mubr.msk.f32.mxu0 %vm93_vm0, %v907_v12  ;;  %v3391_v12 = vmul.f32 %v3385_v59, %v5537_v57  ;;  %v3397_v57 = vmul.f32 %v3385_v59, %v5561_v7 }
 0x21b   :  { %v5577_v16 = vpop.f32.mrb[15].mxu1  ;;  %4749 = vmatmul.mubr.msk.f32.gmra.mrb[28].mxu0 %vm93_vm0, %v908_v13  ;;  %v910_v18 = vmul.f32 %v5574_v14, %v894_v48  ;;  %v1744_v37 = vmul.f32 %v5574_v14, %v1728_v19  ;;  %v2567_v48 = vmul.f32 %v5550_v2, %v2557_v38  ;;  %v2573_v62 = vmul.f32 %v5574_v14, %v2557_v38 }
 0x21c   :  { %v909_v17 = vmul.f32 %v893_v46, %v5577_v16  ;;  %v1743_v35 = vmul.f32 %v1727_v15, %v5577_v16  ;;  %v2565_v46 = vmul.f32 %v5542_v60, %v2557_v38  ;;  %v2572_v58 = vmul.f32 %v2556_v36, %v5577_v16 }
 0x21d   :  { %v3393_v13 = vmul.f32 %v3385_v59, %v5545_v61  ;;  %v3399_v61 = vmul.f32 %v3385_v59, %v5569_v11  ;;  %v3400_v60 = vmul.f32 %v5566_v10, %v3386_v63  ;;  %v3402_v2 = vmul.f32 %v5574_v14, %v3386_v63 }
 0x21e   :  { %4751 = vmatprep.mubr.msk.f32.mxu0 %vm93_vm0, %v909_v17 }
 0x21f   :  { %4752 = vmatmul.mubr.msk.f32.gmra.mrb[30].mxu0 %vm93_vm0, %v910_v18 }
 0x220   :  { %4814 = vmatprep.mubr.msk.f32.mxu0 %vm93_vm0, %v1729_v20 }
 0x223   :  { %4815 = vmatmul.mubr.msk.f32.vlgmr.msra.gmra.mrb[32].mxu0 %vm93_vm0, %v1730_v22 }
 0x224   :  { %4817 = vmatprep.mubr.msk.f32.mxu0 %vm93_vm0, %v1731_v23  ;;  %5173 = vmatpush3.bf16.msra.mxu0 %v5496_v21 }
 0x225   :  { %5207 = vmatprep.subr.bf16.mxu0 %v5496_v21 }
 0x227   :  { %4818 = vmatmul.mubr.msk.f32.gmra.mrb[34].mxu0 %vm93_vm0, %v1732_v24 }
 0x228   :  { %4820 = vmatprep.mubr.msk.f32.mxu0 %vm93_vm0, %v1733_v25 }
 0x22b   :  { %4821 = vmatmul.mubr.msk.f32.gmra.mrb[36].mxu0 %vm93_vm0, %v1734_v26 }
 0x22c   :  { %4823 = vmatprep.mubr.msk.f32.mxu0 %vm93_vm0, %v1735_v27 }
 0x22f   :  { %4824 = vmatmul.mubr.msk.f32.gmra.mrb[38].mxu0 %vm93_vm0, %v1736_v28 }
 0x230   :  { %4826 = vmatprep.mubr.msk.f32.mxu0 %vm93_vm0, %v1737_v29 }
 0x233   :  { %4827 = vmatmul.mubr.msk.f32.gmra.mrb[40].mxu0 %vm93_vm0, %v1738_v30 }
 0x234   :  { %4829 = vmatprep.mubr.msk.f32.mxu0 %vm93_vm0, %v1739_v31 }
 0x237   :  { %4830 = vmatmul.mubr.msk.f32.gmra.mrb[42].mxu0 %vm93_vm0, %v1740_v32 }
 0x238   :  { %4832 = vmatprep.mubr.msk.f32.mxu0 %vm93_vm0, %v1741_v33 }
 0x23b   :  { %4833 = vmatmul.mubr.msk.f32.gmra.mrb[44].mxu0 %vm93_vm0, %v1742_v34 }
 0x23c   :  { %4835 = vmatprep.mubr.msk.f32.mxu0 %vm93_vm0, %v1743_v35 }
 0x23f   :  { %4836 = vmatmul.mubr.msk.f32.gmra.mrb[46].mxu0 %vm93_vm0, %v1744_v37 }
 0x240   :  { %4898 = vmatprep.mubr.msk.f32.mxu0 %vm93_vm0, %v2558_v39 }
 0x243   :  { %4899 = vmatmul.mubr.msk.f32.vlgmr.msra.gmra.mrb[48].mxu0 %vm93_vm0, %v2559_v40 }
 0x244   :  { %4901 = vmatprep.mubr.msk.f32.mxu0 %vm93_vm0, %v2560_v41  ;;  %5209 = vmatpush3.bf16.msra.mxu0 %v5496_v21  ;;  %v2566_v21 = vmul.f32 %v2556_v36, %v5553_v3  ;;  %v3401_v3 = vmul.f32 %v3385_v59, %v5577_v16 }
 0x247   :  { %4902 = vmatmul.mubr.msk.f32.gmra.mrb[50].mxu0 %vm93_vm0, %v2561_v42 }
 0x248   :  { %4904 = vmatprep.mubr.msk.f32.mxu0 %vm93_vm0, %v2562_v43 }
 0x24b   :  { %4905 = vmatmul.mubr.msk.f32.gmra.mrb[52].mxu0 %vm93_vm0, %v2563_v44 }
 0x24c   :  { %4907 = vmatprep.mubr.msk.f32.mxu0 %vm93_vm0, %v2564_v45 }
 0x24f   :  { %4908 = vmatmul.mubr.msk.f32.gmra.mrb[54].mxu0 %vm93_vm0, %v2565_v46 }
 0x250   :  { %4910 = vmatprep.mubr.msk.f32.mxu0 %vm93_vm0, %v2566_v21 }
 0x253   :  { %4911 = vmatmul.mubr.msk.f32.gmra.mrb[56].mxu0 %vm93_vm0, %v2567_v48 }
 0x254   :  { %4913 = vmatprep.mubr.msk.f32.mxu0 %vm93_vm0, %v2568_v50 }
 0x257   :  { %4914 = vmatmul.mubr.msk.f32.gmra.mrb[58].mxu0 %vm93_vm0, %v2569_v51 }
 0x258   :  { %4916 = vmatprep.mubr.msk.f32.mxu0 %vm93_vm0, %v2570_v54 }
 0x25b   :  { %4917 = vmatmul.mubr.msk.f32.gmra.mrb[60].mxu0 %vm93_vm0, %v2571_v55 }
 0x25c   :  { %4919 = vmatprep.mubr.msk.f32.mxu0 %vm93_vm0, %v2572_v58 }
 0x25f   :  { %4920 = vmatmul.mubr.msk.f32.gmra.mrb[62].mxu0 %vm93_vm0, %v2573_v62 }
 0x260   :  { %4982 = vmatprep.mubr.msk.f32.mxu0 %vm93_vm0, %v3387_v4 }
 0x263   :  { %4983 = vmatmul.mubr.msk.f32.vlgmr.msra.gmra.mrb[64].mxu0 %vm93_vm0, %v3388_v5 }
 0x264   :  { %4985 = vmatprep.mubr.msk.f32.mxu0 %vm93_vm0, %v3389_v8 }
 0x267   :  { %4986 = vmatmul.mubr.msk.f32.gmra.mrb[66].mxu0 %vm93_vm0, %v3390_v9 }
 0x268   :  { %4988 = vmatprep.mubr.msk.f32.mxu0 %vm93_vm0, %v3391_v12 }
 0x26b   :  { %4989 = vmatmul.mubr.msk.f32.gmra.mrb[68].mxu0 %vm93_vm0, %v3392_v49 }
 0x26c   :  { %4991 = vmatprep.mubr.msk.f32.mxu0 %vm93_vm0, %v3393_v13 }
 0x26f   :  { %4992 = vmatmul.mubr.msk.f32.gmra.mrb[70].mxu0 %vm93_vm0, %v3394_v47 }
 0x270   :  { %4994 = vmatprep.mubr.msk.f32.mxu0 %vm93_vm0, %v3395_v53 }
 0x273   :  { %4995 = vmatmul.mubr.msk.f32.gmra.mrb[72].mxu0 %vm93_vm0, %v3396_v52 }
 0x274   :  { %4997 = vmatprep.mubr.msk.f32.mxu0 %vm93_vm0, %v3397_v57 }
 0x277   :  { %4998 = vmatmul.mubr.msk.f32.gmra.mrb[74].mxu0 %vm93_vm0, %v3398_v56 }
 0x278   :  { %5000 = vmatprep.mubr.msk.f32.mxu0 %vm93_vm0, %v3399_v61 }
 0x27b   :  { %5001 = vmatmul.mubr.msk.f32.gmra.mrb[76].mxu0 %vm93_vm0, %v3400_v60 }
 0x27c   :  { %5003 = vmatprep.mubr.msk.f32.mxu0 %vm93_vm0, %v3401_v3 }
 0x27f   :  { %5004 = vmatmul.mubr.msk.f32.gmra.mrb[78].mxu0 %vm93_vm0, %v3402_v2 }
 0x2d6   :  { %v4732_v7 = vpop.f32.mrb[16].mxu0 }
 0x2d7   :  { %v1025_v6 = vpop.f32.mrb[17].mxu0 }
 0x2d8   :  { %v5102_v15 = vpack.c.bf16 %v4732_v7, %v1025_v6 }
 0x2da   :  { %v4735_v11 = vpop.f32.mrb[18].mxu0  ;;  %5103 = vmatprep.subr.bf16.mxu1 %v5102_v15 }
 0x2db   :  { %v1035_v17 = vpop.f32.mrb[19].mxu0  ;;  %5105 = vmatpush3.bf16.msra.mxu1 %v5102_v15 }
 0x2dc   :  { %v5106_v18 = vpack.c.bf16 %v4735_v11, %v1035_v17 }
 0x2de   :  { %v4738_v19 = vpop.f32.mrb[20].mxu0  ;;  %4759 = vmatmul.mubr.msk.f32.vlgmr.msra.gmra.mrb[16].mxu1 %vm93_vm0, %v5475_v1  ;;  %5107 = vmatprep.subr.bf16.mxu1 %v5106_v18 }
 0x2df   :  { %v1045_v10 = vpop.f32.mrb[21].mxu0  ;;  %5109 = vmatpush3.bf16.msra.mxu1 %v5106_v18  ;;  %4765 = vmatprep.mubr.msk.f32.mxu1 %vm93_vm0, %v5473_v0 }
 0x2e0   :  { %v5110_v14 = vpack.c.bf16 %v4738_v19, %v1045_v10 }
 0x2e2   :  { %v4741_v16 = vpop.f32.mrb[22].mxu0  ;;  %4766 = vmatmul.mubr.msk.f32.vlgmr.msra.gmra.mrb[18].mxu1 %vm93_vm0, %v5475_v1  ;;  %5111 = vmatprep.subr.bf16.mxu1 %v5110_v14 }
 0x2e3   :  { %v1055_v20 = vpop.f32.mrb[23].mxu0  ;;  %5113 = vmatpush3.bf16.msra.mxu1 %v5110_v14  ;;  %4772 = vmatprep.mubr.msk.f32.mxu1 %vm93_vm0, %v5473_v0 }
 0x2e4   :  { %v5114_v22 = vpack.c.bf16 %v4741_v16, %v1055_v20 }
 0x2e6   :  { %v4744_v23 = vpop.f32.mrb[24].mxu0  ;;  %4773 = vmatmul.mubr.msk.f32.vlgmr.msra.gmra.mrb[20].mxu1 %vm93_vm0, %v5475_v1  ;;  %5115 = vmatprep.subr.bf16.mxu1 %v5114_v22 }
 0x2e7   :  { %v1065_v24 = vpop.f32.mrb[25].mxu0  ;;  %5117 = vmatpush3.bf16.msra.mxu1 %v5114_v22  ;;  %4779 = vmatprep.mubr.msk.f32.mxu1 %vm93_vm0, %v5473_v0 }
 0x2e8   :  { %v5118_v25 = vpack.c.bf16 %v4744_v23, %v1065_v24 }
 0x2ea   :  { %v4747_v26 = vpop.f32.mrb[26].mxu0  ;;  %4780 = vmatmul.mubr.msk.f32.vlgmr.msra.gmra.mrb[22].mxu1 %vm93_vm0, %v5475_v1  ;;  %5119 = vmatprep.subr.bf16.mxu1 %v5118_v25 }
 0x2eb   :  { %v1075_v27 = vpop.f32.mrb[27].mxu0  ;;  %5121 = vmatpush3.bf16.msra.mxu1 %v5118_v25  ;;  %4786 = vmatprep.mubr.msk.f32.mxu1 %vm93_vm0, %v5473_v0 }
 0x2ec   :  { %v5122_v28 = vpack.c.bf16 %v4747_v26, %v1075_v27 }
 0x2ee   :  { %v4750_v29 = vpop.f32.mrb[28].mxu0  ;;  %4787 = vmatmul.mubr.msk.f32.vlgmr.msra.gmra.mrb[24].mxu1 %vm93_vm0, %v5475_v1  ;;  %5123 = vmatprep.subr.bf16.mxu1 %v5122_v28 }
 0x2ef   :  { %v1085_v30 = vpop.f32.mrb[29].mxu0  ;;  %5125 = vmatpush3.bf16.msra.mxu1 %v5122_v28  ;;  %4793 = vmatprep.mubr.msk.f32.mxu1 %vm93_vm0, %v5473_v0 }
 0x2f0   :  { %v5126_v31 = vpack.c.bf16 %v4750_v29, %v1085_v30 }
 0x2f2   :  { %v4753_v32 = vpop.f32.mrb[30].mxu0  ;;  %4794 = vmatmul.mubr.msk.f32.vlgmr.msra.gmra.mrb[26].mxu1 %vm93_vm0, %v5475_v1  ;;  %5127 = vmatprep.subr.bf16.mxu1 %v5126_v31 }
 0x2f3   :  { %v1095_v33 = vpop.f32.mrb[31].mxu0  ;;  %5129 = vmatpush3.bf16.msra.mxu1 %v5126_v31  ;;  %4800 = vmatprep.mubr.msk.f32.mxu1 %vm93_vm0, %v5473_v0 }
 0x2f4   :  { %v5130_v34 = vpack.c.bf16 %v4753_v32, %v1095_v33 }
 0x2f6   :  { %4801 = vmatmul.mubr.msk.f32.vlgmr.msra.gmra.mrb[28].mxu1 %vm93_vm0, %v5475_v1  ;;  %5131 = vmatprep.subr.bf16.mxu1 %v5130_v34  ;;  %v4816_v35 = vpop.f32.mrb[32].mxu0 }
 0x2f7   :  { %5133 = vmatpush3.bf16.msra.mxu1 %v5130_v34  ;;  %v1859_v36 = vpop.f32.mrb[33].mxu0  ;;  %4807 = vmatprep.mubr.msk.f32.mxu1 %vm93_vm0, %v5473_v0 }
 0x2f8   :  { %v5138_v37 = vpack.c.bf16 %v4816_v35, %v1859_v36 }
 0x2fa   :  { %4808 = vmatmul.mubr.msk.f32.vlgmr.msra.gmra.mrb[30].mxu1 %vm93_vm0, %v5475_v1  ;;  %v4819_v38 = vpop.f32.mrb[34].mxu0  ;;  %5139 = vmatprep.subr.bf16.mxu1 %v5138_v37 }
 0x2fb   :  { %v1869_v39 = vpop.f32.mrb[35].mxu0  ;;  %5141 = vmatpush3.bf16.msra.mxu1 %v5138_v37  ;;  %4842 = vmatprep.mubr.msk.f32.mxu1 %vm93_vm0, %v5473_v0 }
 0x2fc   :  { %v5142_v40 = vpack.c.bf16 %v4819_v38, %v1869_v39 }
 0x2fe   :  { %v4822_v41 = vpop.f32.mrb[36].mxu0  ;;  %4843 = vmatmul.mubr.msk.f32.vlgmr.msra.gmra.mrb[32].mxu1 %vm93_vm0, %v5475_v1  ;;  %5143 = vmatprep.subr.bf16.mxu1 %v5142_v40 }
 0x2ff   :  { %v1879_v42 = vpop.f32.mrb[37].mxu0  ;;  %5145 = vmatpush3.bf16.msra.mxu1 %v5142_v40  ;;  %4849 = vmatprep.mubr.msk.f32.mxu1 %vm93_vm0, %v5473_v0 }
 0x300   :  { %v5146_v43 = vpack.c.bf16 %v4822_v41, %v1879_v42 }
 0x302   :  { %v4825_v44 = vpop.f32.mrb[38].mxu0  ;;  %4850 = vmatmul.mubr.msk.f32.vlgmr.msra.gmra.mrb[34].mxu1 %vm93_vm0, %v5475_v1  ;;  %5147 = vmatprep.subr.bf16.mxu1 %v5146_v43 }
 0x303   :  { %v1889_v45 = vpop.f32.mrb[39].mxu0  ;;  %5149 = vmatpush3.bf16.msra.mxu1 %v5146_v43  ;;  %4856 = vmatprep.mubr.msk.f32.mxu1 %vm93_vm0, %v5473_v0 }
 0x304   :  { %v5150_v46 = vpack.c.bf16 %v4825_v44, %v1889_v45 }
 0x306   :  { %v4828_v21 = vpop.f32.mrb[40].mxu0  ;;  %4857 = vmatmul.mubr.msk.f32.vlgmr.msra.gmra.mrb[36].mxu1 %vm93_vm0, %v5475_v1  ;;  %5151 = vmatprep.subr.bf16.mxu1 %v5150_v46 }
 0x307   :  { %v1899_v48 = vpop.f32.mrb[41].mxu0  ;;  %5153 = vmatpush3.bf16.msra.mxu1 %v5150_v46  ;;  %4863 = vmatprep.mubr.msk.f32.mxu1 %vm93_vm0, %v5473_v0 }
 0x308   :  { %v5154_v50 = vpack.c.bf16 %v4828_v21, %v1899_v48 }
 0x30a   :  { %v4831_v51 = vpop.f32.mrb[42].mxu0  ;;  %4864 = vmatmul.mubr.msk.f32.vlgmr.msra.gmra.mrb[38].mxu1 %vm93_vm0, %v5475_v1  ;;  %5155 = vmatprep.subr.bf16.mxu1 %v5154_v50 }
 0x30b   :  { %v1909_v54 = vpop.f32.mrb[43].mxu0  ;;  %5157 = vmatpush3.bf16.msra.mxu1 %v5154_v50  ;;  %4870 = vmatprep.mubr.msk.f32.mxu1 %vm93_vm0, %v5473_v0 }
 0x30c   :  { %v5158_v55 = vpack.c.bf16 %v4831_v51, %v1909_v54 }
 0x30e   :  { %v4834_v58 = vpop.f32.mrb[44].mxu0  ;;  %4871 = vmatmul.mubr.msk.f32.vlgmr.msra.gmra.mrb[40].mxu1 %vm93_vm0, %v5475_v1  ;;  %5159 = vmatprep.subr.bf16.mxu1 %v5158_v55 }
 0x30f   :  { %v1919_v59 = vpop.f32.mrb[45].mxu0  ;;  %5161 = vmatpush3.bf16.msra.mxu1 %v5158_v55  ;;  %4877 = vmatprep.mubr.msk.f32.mxu1 %vm93_vm0, %v5473_v0 }
 0x310   :  { %v5162_v62 = vpack.c.bf16 %v4834_v58, %v1919_v59 }
 0x312   :  { %v4837_v63 = vpop.f32.mrb[46].mxu0  ;;  %4878 = vmatmul.mubr.msk.f32.vlgmr.msra.gmra.mrb[42].mxu1 %vm93_vm0, %v5475_v1  ;;  %5163 = vmatprep.subr.bf16.mxu1 %v5162_v62 }
 0x313   :  { %v1929_v4 = vpop.f32.mrb[47].mxu0  ;;  %5165 = vmatpush3.bf16.msra.mxu1 %v5162_v62  ;;  %4884 = vmatprep.mubr.msk.f32.mxu1 %vm93_vm0, %v5473_v0 }
 0x314   :  { %v5166_v5 = vpack.c.bf16 %v4837_v63, %v1929_v4 }
 0x316   :  { %4885 = vmatmul.mubr.msk.f32.vlgmr.msra.gmra.mrb[44].mxu1 %vm93_vm0, %v5475_v1  ;;  %5167 = vmatprep.subr.bf16.mxu1 %v5166_v5  ;;  %v4900_v8 = vpop.f32.mrb[48].mxu0 }
 0x317   :  { %5169 = vmatpush3.bf16.msra.mxu1 %v5166_v5  ;;  %v2688_v9 = vpop.f32.mrb[49].mxu0  ;;  %4891 = vmatprep.mubr.msk.f32.mxu1 %vm93_vm0, %v5473_v0 }
 0x318   :  { %v5174_v12 = vpack.c.bf16 %v4900_v8, %v2688_v9 }
 0x31a   :  { %4892 = vmatmul.mubr.msk.f32.vlgmr.msra.gmra.mrb[46].mxu1 %vm93_vm0, %v5475_v1  ;;  %v4903_v49 = vpop.f32.mrb[50].mxu0  ;;  %5175 = vmatprep.subr.bf16.mxu1 %v5174_v12 }
 0x31b   :  { %v2698_v13 = vpop.f32.mrb[51].mxu0  ;;  %5177 = vmatpush3.bf16.msra.mxu1 %v5174_v12  ;;  %4926 = vmatprep.mubr.msk.f32.mxu1 %vm93_vm0, %v5473_v0 }
 0x31c   :  { %v5178_v47 = vpack.c.bf16 %v4903_v49, %v2698_v13 }
 0x31e   :  { %v4906_v53 = vpop.f32.mrb[52].mxu0  ;;  %4927 = vmatmul.mubr.msk.f32.vlgmr.msra.gmra.mrb[48].mxu1 %vm93_vm0, %v5475_v1  ;;  %5179 = vmatprep.subr.bf16.mxu1 %v5178_v47 }
 0x31f   :  { %v2708_v52 = vpop.f32.mrb[53].mxu0  ;;  %5181 = vmatpush3.bf16.msra.mxu1 %v5178_v47  ;;  %4933 = vmatprep.mubr.msk.f32.mxu1 %vm93_vm0, %v5473_v0 }
 0x320   :  { %v5182_v57 = vpack.c.bf16 %v4906_v53, %v2708_v52 }
 0x322   :  { %v4909_v56 = vpop.f32.mrb[54].mxu0  ;;  %4934 = vmatmul.mubr.msk.f32.vlgmr.msra.gmra.mrb[50].mxu1 %vm93_vm0, %v5475_v1  ;;  %5183 = vmatprep.subr.bf16.mxu1 %v5182_v57 }
 0x323   :  { %v2718_v61 = vpop.f32.mrb[55].mxu0  ;;  %5185 = vmatpush3.bf16.msra.mxu1 %v5182_v57  ;;  %4940 = vmatprep.mubr.msk.f32.mxu1 %vm93_vm0, %v5473_v0 }
 0x324   :  { %v5186_v60 = vpack.c.bf16 %v4909_v56, %v2718_v61 }
 0x326   :  { %v4912_v3 = vpop.f32.mrb[56].mxu0  ;;  %4941 = vmatmul.mubr.msk.f32.vlgmr.msra.gmra.mrb[52].mxu1 %vm93_vm0, %v5475_v1  ;;  %5187 = vmatprep.subr.bf16.mxu1 %v5186_v60 }
 0x327   :  { %v2728_v2 = vpop.f32.mrb[57].mxu0  ;;  %5189 = vmatpush3.bf16.msra.mxu1 %v5186_v60  ;;  %4947 = vmatprep.mubr.msk.f32.mxu1 %vm93_vm0, %v5473_v0 }
 0x328   :  { %v5190_v7 = vpack.c.bf16 %v4912_v3, %v2728_v2 }
 0x32a   :  { %v4915_v6 = vpop.f32.mrb[58].mxu0  ;;  %4948 = vmatmul.mubr.msk.f32.vlgmr.msra.gmra.mrb[54].mxu1 %vm93_vm0, %v5475_v1  ;;  %5191 = vmatprep.subr.bf16.mxu1 %v5190_v7 }
 0x32b   :  { %v2738_v15 = vpop.f32.mrb[59].mxu0  ;;  %5193 = vmatpush3.bf16.msra.mxu1 %v5190_v7  ;;  %4954 = vmatprep.mubr.msk.f32.mxu1 %vm93_vm0, %v5473_v0 }
 0x32c   :  { %v5194_v11 = vpack.c.bf16 %v4915_v6, %v2738_v15 }
 0x32e   :  { %v4918_v17 = vpop.f32.mrb[60].mxu0  ;;  %4955 = vmatmul.mubr.msk.f32.vlgmr.msra.gmra.mrb[56].mxu1 %vm93_vm0, %v5475_v1  ;;  %5195 = vmatprep.subr.bf16.mxu1 %v5194_v11 }
 0x32f   :  { %v2748_v18 = vpop.f32.mrb[61].mxu0  ;;  %5197 = vmatpush3.bf16.msra.mxu1 %v5194_v11  ;;  %4961 = vmatprep.mubr.msk.f32.mxu1 %vm93_vm0, %v5473_v0 }
 0x330   :  { %v5198_v19 = vpack.c.bf16 %v4918_v17, %v2748_v18 }
 0x332   :  { %v4921_v10 = vpop.f32.mrb[62].mxu0  ;;  %4962 = vmatmul.mubr.msk.f32.vlgmr.msra.gmra.mrb[58].mxu1 %vm93_vm0, %v5475_v1  ;;  %5199 = vmatprep.subr.bf16.mxu1 %v5198_v19 }
 0x333   :  { %v2758_v14 = vpop.f32.mrb[63].mxu0  ;;  %5201 = vmatpush3.bf16.msra.mxu1 %v5198_v19  ;;  %4968 = vmatprep.mubr.msk.f32.mxu1 %vm93_vm0, %v5473_v0 }
 0x334   :  { %v5202_v16 = vpack.c.bf16 %v4921_v10, %v2758_v14 }
 0x336   :  { %4969 = vmatmul.mubr.msk.f32.vlgmr.msra.gmra.mrb[60].mxu1 %vm93_vm0, %v5475_v1  ;;  %5203 = vmatprep.subr.bf16.mxu1 %v5202_v16  ;;  %v4984_v20 = vpop.f32.mrb[64].mxu0 }
 0x337   :  { %5205 = vmatpush3.bf16.msra.mxu1 %v5202_v16  ;;  %v3517_v22 = vpop.f32.mrb[65].mxu0  ;;  %4975 = vmatprep.mubr.msk.f32.mxu1 %vm93_vm0, %v5473_v0 }
 0x338   :  { %v5210_v23 = vpack.c.bf16 %v4984_v20, %v3517_v22 }
 0x33a   :  { %4976 = vmatmul.mubr.msk.f32.vlgmr.msra.gmra.mrb[62].mxu1 %vm93_vm0, %v5475_v1  ;;  %v4987_v24 = vpop.f32.mrb[66].mxu0  ;;  %5211 = vmatprep.subr.bf16.mxu1 %v5210_v23 }
 0x33b   :  { %v3527_v25 = vpop.f32.mrb[67].mxu0  ;;  %5213 = vmatpush3.bf16.msra.mxu1 %v5210_v23  ;;  %5010 = vmatprep.mubr.msk.f32.mxu1 %vm93_vm0, %v5473_v0 }
 0x33c   :  { %v5214_v26 = vpack.c.bf16 %v4987_v24, %v3527_v25 }
 0x33e   :  { %v4990_v27 = vpop.f32.mrb[68].mxu0  ;;  %5011 = vmatmul.mubr.msk.f32.vlgmr.msra.gmra.mrb[64].mxu1 %vm93_vm0, %v5475_v1  ;;  %5215 = vmatprep.subr.bf16.mxu1 %v5214_v26 }
 0x33f   :  { %v3537_v28 = vpop.f32.mrb[69].mxu0  ;;  %5217 = vmatpush3.bf16.msra.mxu1 %v5214_v26  ;;  %5017 = vmatprep.mubr.msk.f32.mxu1 %vm93_vm0, %v5473_v0 }
 0x340   :  { %v5218_v29 = vpack.c.bf16 %v4990_v27, %v3537_v28 }
 0x342   :  { %v4993_v30 = vpop.f32.mrb[70].mxu0  ;;  %5018 = vmatmul.mubr.msk.f32.vlgmr.msra.gmra.mrb[66].mxu1 %vm93_vm0, %v5475_v1  ;;  %5219 = vmatprep.subr.bf16.mxu1 %v5218_v29 }
 0x343   :  { %v3547_v31 = vpop.f32.mrb[71].mxu0  ;;  %5221 = vmatpush3.bf16.msra.mxu1 %v5218_v29  ;;  %5024 = vmatprep.mubr.msk.f32.mxu1 %vm93_vm0, %v5473_v0 }
 0x344   :  { %v5222_v32 = vpack.c.bf16 %v4993_v30, %v3547_v31 }
 0x346   :  { %v4996_v33 = vpop.f32.mrb[72].mxu0  ;;  %5025 = vmatmul.mubr.msk.f32.vlgmr.msra.gmra.mrb[68].mxu1 %vm93_vm0, %v5475_v1  ;;  %5223 = vmatprep.subr.bf16.mxu1 %v5222_v32 }
 0x347   :  { %v3557_v34 = vpop.f32.mrb[73].mxu0  ;;  %5225 = vmatpush3.bf16.msra.mxu1 %v5222_v32  ;;  %5031 = vmatprep.mubr.msk.f32.mxu1 %vm93_vm0, %v5473_v0 }
 0x348   :  { %v5226_v35 = vpack.c.bf16 %v4996_v33, %v3557_v34 }
 0x34a   :  { %v4999_v36 = vpop.f32.mrb[74].mxu0  ;;  %5032 = vmatmul.mubr.msk.f32.vlgmr.msra.gmra.mrb[70].mxu1 %vm93_vm0, %v5475_v1  ;;  %5227 = vmatprep.subr.bf16.mxu1 %v5226_v35 }
 0x34b   :  { %v3567_v37 = vpop.f32.mrb[75].mxu0  ;;  %5229 = vmatpush3.bf16.msra.mxu1 %v5226_v35  ;;  %5038 = vmatprep.mubr.msk.f32.mxu1 %vm93_vm0, %v5473_v0 }
 0x34c   :  { %v5230_v38 = vpack.c.bf16 %v4999_v36, %v3567_v37 }
 0x34e   :  { %v5002_v39 = vpop.f32.mrb[76].mxu0  ;;  %5039 = vmatmul.mubr.msk.f32.vlgmr.msra.gmra.mrb[72].mxu1 %vm93_vm0, %v5475_v1  ;;  %5231 = vmatprep.subr.bf16.mxu1 %v5230_v38 }
 0x34f   :  { %v3577_v40 = vpop.f32.mrb[77].mxu0  ;;  %5233 = vmatpush3.bf16.msra.mxu1 %v5230_v38  ;;  %5045 = vmatprep.mubr.msk.f32.mxu1 %vm93_vm0, %v5473_v0 }
 0x350   :  { %v5234_v41 = vpack.c.bf16 %v5002_v39, %v3577_v40 }
 0x352   :  { %v5005_v42 = vpop.f32.mrb[78].mxu0  ;;  %5046 = vmatmul.mubr.msk.f32.vlgmr.msra.gmra.mrb[74].mxu1 %vm93_vm0, %v5475_v1  ;;  %5235 = vmatprep.subr.bf16.mxu1 %v5234_v41 }
 0x353   :  { %v3587_v43 = vpop.f32.mrb[79].mxu0  ;;  %5237 = vmatpush3.bf16.msra.mxu1 %v5234_v41  ;;  %5052 = vmatprep.mubr.msk.f32.mxu1 %vm93_vm0, %v5473_v0 }
 0x354   :  { %v5238_v44 = vpack.c.bf16 %v5005_v42, %v3587_v43 }
 0x356   :  { %5053 = vmatmul.mubr.msk.f32.vlgmr.msra.gmra.mrb[76].mxu1 %vm93_vm0, %v5475_v1  ;;  %5239 = vmatprep.subr.bf16.mxu1 %v5238_v44 }
 0x357   :  { %5241 = vmatpush3.bf16.msra.mxu1 %v5238_v44  ;;  %5059 = vmatprep.mubr.msk.f32.mxu1 %vm93_vm0, %v5473_v0 }
 0x35a   :  { %5060 = vmatmul.mubr.msk.f32.vlgmr.msra.gmra.mrb[78].mxu1 %vm93_vm0, %v5475_v1 }
 0x3b1   :  { %v4760_v45 = vpop.f32.mrb[16].mxu1 }
 0x3b2   :  { %1711 = vst.msk [vmem:[#allocation10 + $0x8] sm:$0xff] %vm93_vm0, %v4760_v45  ;;  %v1176_v46 = vpop.f32.mrb[17].mxu1 }
 0x3b3   :  { %1710 = vst.msk [vmem:[#allocation10] sm:$0xff] %vm93_vm0, %v1176_v46 }
 0x3b5   :  { %v4767_v21 = vpop.f32.mrb[18].mxu1 }
 0x3b6   :  { %1713 = vst.msk [vmem:[#allocation10 + $0x18] sm:$0xff] %vm93_vm0, %v4767_v21  ;;  %v1251_v48 = vpop.f32.mrb[19].mxu1 }
 0x3b7   :  { %1712 = vst.msk [vmem:[#allocation10 + $0x10] sm:$0xff] %vm93_vm0, %v1251_v48 }
 0x3b9   :  { %v4774_v50 = vpop.f32.mrb[20].mxu1 }
 0x3ba   :  { %1715 = vst.msk [vmem:[#allocation10 + $0x28] sm:$0xff] %vm93_vm0, %v4774_v50  ;;  %v1326_v51 = vpop.f32.mrb[21].mxu1 }
 0x3bb   :  { %1714 = vst.msk [vmem:[#allocation10 + $0x20] sm:$0xff] %vm93_vm0, %v1326_v51 }
 0x3bd   :  { %v4781_v0 = vpop.f32.mrb[22].mxu1 }
 0x3be   :  { %1717 = vst.msk [vmem:[#allocation10 + $0x38] sm:$0xff] %vm93_vm0, %v4781_v0  ;;  %v1401_v1 = vpop.f32.mrb[23].mxu1 }
 0x3bf   :  { %1716 = vst.msk [vmem:[#allocation10 + $0x30] sm:$0xff] %vm93_vm0, %v1401_v1 }
 0x3c1   :  { %v4788_v54 = vpop.f32.mrb[24].mxu1 }
 0x3c2   :  { %1719 = vst.msk [vmem:[#allocation10 + $0x48] sm:$0xff] %vm93_vm0, %v4788_v54  ;;  %v1476_v55 = vpop.f32.mrb[25].mxu1 }
 0x3c3   :  { %1718 = vst.msk [vmem:[#allocation10 + $0x40] sm:$0xff] %vm93_vm0, %v1476_v55 }
 0x3c5   :  { %v4795_v58 = vpop.f32.mrb[26].mxu1 }
 0x3c6   :  { %1721 = vst.msk [vmem:[#allocation10 + $0x58] sm:$0xff] %vm93_vm0, %v4795_v58  ;;  %v1551_v59 = vpop.f32.mrb[27].mxu1 }
 0x3c7   :  { %1720 = vst.msk [vmem:[#allocation10 + $0x50] sm:$0xff] %vm93_vm0, %v1551_v59 }
 0x3c9   :  { %v4802_v62 = vpop.f32.mrb[28].mxu1 }
 0x3ca   :  { %1723 = vst.msk [vmem:[#allocation10 + $0x68] sm:$0xff] %vm93_vm0, %v4802_v62  ;;  %v1626_v63 = vpop.f32.mrb[29].mxu1 }
 0x3cb   :  { %1722 = vst.msk [vmem:[#allocation10 + $0x60] sm:$0xff] %vm93_vm0, %v1626_v63 }
 0x3cd   :  { %v4809_v4 = vpop.f32.mrb[30].mxu1 }
 0x3ce   :  { %1725 = vst.msk [vmem:[#allocation10 + $0x78] sm:$0xff] %vm93_vm0, %v4809_v4  ;;  %v1701_v5 = vpop.f32.mrb[31].mxu1 }
 0x3cf   :  { %1724 = vst.msk [vmem:[#allocation10 + $0x70] sm:$0xff] %vm93_vm0, %v1701_v5 }
 0x3d1   :  { %v4844_v8 = vpop.f32.mrb[32].mxu1 }
 0x3d2   :  { %2540 = vst.msk [vmem:[#allocation10 + $0x88] sm:$0xff] %vm93_vm0, %v4844_v8  ;;  %v2004_v9 = vpop.f32.mrb[33].mxu1 }
 0x3d3   :  { %2539 = vst.msk [vmem:[#allocation10 + $0x80] sm:$0xff] %vm93_vm0, %v2004_v9 }
 0x3d5   :  { %v4851_v12 = vpop.f32.mrb[34].mxu1 }
 0x3d6   :  { %2542 = vst.msk [vmem:[#allocation10 + $0x98] sm:$0xff] %vm93_vm0, %v4851_v12  ;;  %v2079_v49 = vpop.f32.mrb[35].mxu1 }
 0x3d7   :  { %2541 = vst.msk [vmem:[#allocation10 + $0x90] sm:$0xff] %vm93_vm0, %v2079_v49 }
 0x3d9   :  { %v4858_v13 = vpop.f32.mrb[36].mxu1 }
 0x3da   :  { %2544 = vst.msk [vmem:[#allocation10 + $0xa8] sm:$0xff] %vm93_vm0, %v4858_v13  ;;  %v2154_v47 = vpop.f32.mrb[37].mxu1 }
 0x3db   :  { %2543 = vst.msk [vmem:[#allocation10 + $0xa0] sm:$0xff] %vm93_vm0, %v2154_v47 }
 0x3dd   :  { %v4865_v53 = vpop.f32.mrb[38].mxu1 }
 0x3de   :  { %2546 = vst.msk [vmem:[#allocation10 + $0xb8] sm:$0xff] %vm93_vm0, %v4865_v53  ;;  %v2229_v52 = vpop.f32.mrb[39].mxu1 }
 0x3df   :  { %2545 = vst.msk [vmem:[#allocation10 + $0xb0] sm:$0xff] %vm93_vm0, %v2229_v52 }
 0x3e1   :  { %v4872_v57 = vpop.f32.mrb[40].mxu1 }
 0x3e2   :  { %2548 = vst.msk [vmem:[#allocation10 + $0xc8] sm:$0xff] %vm93_vm0, %v4872_v57  ;;  %v2304_v56 = vpop.f32.mrb[41].mxu1 }
 0x3e3   :  { %2547 = vst.msk [vmem:[#allocation10 + $0xc0] sm:$0xff] %vm93_vm0, %v2304_v56 }
 0x3e5   :  { %v4879_v61 = vpop.f32.mrb[42].mxu1 }
 0x3e6   :  { %2550 = vst.msk [vmem:[#allocation10 + $0xd8] sm:$0xff] %vm93_vm0, %v4879_v61  ;;  %v2379_v60 = vpop.f32.mrb[43].mxu1 }
 0x3e7   :  { %2549 = vst.msk [vmem:[#allocation10 + $0xd0] sm:$0xff] %vm93_vm0, %v2379_v60 }
 0x3e9   :  { %v4886_v3 = vpop.f32.mrb[44].mxu1 }
 0x3ea   :  { %2552 = vst.msk [vmem:[#allocation10 + $0xe8] sm:$0xff] %vm93_vm0, %v4886_v3  ;;  %v2454_v2 = vpop.f32.mrb[45].mxu1 }
 0x3eb   :  { %2551 = vst.msk [vmem:[#allocation10 + $0xe0] sm:$0xff] %vm93_vm0, %v2454_v2 }
 0x3ed   :  { %v4893_v7 = vpop.f32.mrb[46].mxu1 }
 0x3ee   :  { %2554 = vst.msk [vmem:[#allocation10 + $0xf8] sm:$0xff] %vm93_vm0, %v4893_v7  ;;  %v2529_v6 = vpop.f32.mrb[47].mxu1 }
 0x3ef   :  { %2553 = vst.msk [vmem:[#allocation10 + $0xf0] sm:$0xff] %vm93_vm0, %v2529_v6 }
 0x3f1   :  { %v4928_v15 = vpop.f32.mrb[48].mxu1 }
 0x3f2   :  { %3369 = vst.msk [vmem:[#allocation10 + $0x108] sm:$0xff] %vm93_vm0, %v4928_v15  ;;  %v2833_v11 = vpop.f32.mrb[49].mxu1 }
 0x3f3   :  { %3368 = vst.msk [vmem:[#allocation10 + $0x100] sm:$0xff] %vm93_vm0, %v2833_v11 }
 0x3f5   :  { %v4935_v17 = vpop.f32.mrb[50].mxu1 }
 0x3f6   :  { %3371 = vst.msk [vmem:[#allocation10 + $0x118] sm:$0xff] %vm93_vm0, %v4935_v17  ;;  %v2908_v18 = vpop.f32.mrb[51].mxu1 }
 0x3f7   :  { %3370 = vst.msk [vmem:[#allocation10 + $0x110] sm:$0xff] %vm93_vm0, %v2908_v18 }
 0x3f9   :  { %v4942_v19 = vpop.f32.mrb[52].mxu1 }
 0x3fa   :  { %3373 = vst.msk [vmem:[#allocation10 + $0x128] sm:$0xff] %vm93_vm0, %v4942_v19  ;;  %v2983_v10 = vpop.f32.mrb[53].mxu1 }
 0x3fb   :  { %3372 = vst.msk [vmem:[#allocation10 + $0x120] sm:$0xff] %vm93_vm0, %v2983_v10 }
 0x3fd   :  { %v4949_v14 = vpop.f32.mrb[54].mxu1 }
 0x3fe   :  { %3375 = vst.msk [vmem:[#allocation10 + $0x138] sm:$0xff] %vm93_vm0, %v4949_v14  ;;  %v3058_v16 = vpop.f32.mrb[55].mxu1 }
 0x3ff   :  { %3374 = vst.msk [vmem:[#allocation10 + $0x130] sm:$0xff] %vm93_vm0, %v3058_v16 }
 0x401   :  { %v4956_v20 = vpop.f32.mrb[56].mxu1 }
 0x402   :  { %3377 = vst.msk [vmem:[#allocation10 + $0x148] sm:$0xff] %vm93_vm0, %v4956_v20  ;;  %v3133_v22 = vpop.f32.mrb[57].mxu1 }
 0x403   :  { %3376 = vst.msk [vmem:[#allocation10 + $0x140] sm:$0xff] %vm93_vm0, %v3133_v22 }
 0x405   :  { %v4963_v23 = vpop.f32.mrb[58].mxu1 }
 0x406   :  { %3379 = vst.msk [vmem:[#allocation10 + $0x158] sm:$0xff] %vm93_vm0, %v4963_v23  ;;  %v3208_v24 = vpop.f32.mrb[59].mxu1 }
 0x407   :  { %3378 = vst.msk [vmem:[#allocation10 + $0x150] sm:$0xff] %vm93_vm0, %v3208_v24 }
 0x409   :  { %v4970_v25 = vpop.f32.mrb[60].mxu1 }
 0x40a   :  { %3381 = vst.msk [vmem:[#allocation10 + $0x168] sm:$0xff] %vm93_vm0, %v4970_v25  ;;  %v3283_v26 = vpop.f32.mrb[61].mxu1 }
 0x40b   :  { %3380 = vst.msk [vmem:[#allocation10 + $0x160] sm:$0xff] %vm93_vm0, %v3283_v26 }
 0x40d   :  { %v4977_v27 = vpop.f32.mrb[62].mxu1 }
 0x40e   :  { %3383 = vst.msk [vmem:[#allocation10 + $0x178] sm:$0xff] %vm93_vm0, %v4977_v27  ;;  %v3358_v28 = vpop.f32.mrb[63].mxu1 }
 0x40f   :  { %3382 = vst.msk [vmem:[#allocation10 + $0x170] sm:$0xff] %vm93_vm0, %v3358_v28 }
 0x411   :  { %v5012_v29 = vpop.f32.mrb[64].mxu1 }
 0x412   :  { %4198 = vst.msk [vmem:[#allocation10 + $0x188] sm:$0xff] %vm93_vm0, %v5012_v29  ;;  %v3662_v30 = vpop.f32.mrb[65].mxu1 }
 0x413   :  { %4197 = vst.msk [vmem:[#allocation10 + $0x180] sm:$0xff] %vm93_vm0, %v3662_v30 }
 0x415   :  { %v5019_v31 = vpop.f32.mrb[66].mxu1 }
 0x416   :  { %4200 = vst.msk [vmem:[#allocation10 + $0x198] sm:$0xff] %vm93_vm0, %v5019_v31  ;;  %v3737_v32 = vpop.f32.mrb[67].mxu1 }
 0x417   :  { %4199 = vst.msk [vmem:[#allocation10 + $0x190] sm:$0xff] %vm93_vm0, %v3737_v32 }
 0x419   :  { %v5026_v33 = vpop.f32.mrb[68].mxu1 }
 0x41a   :  { %4202 = vst.msk [vmem:[#allocation10 + $0x1a8] sm:$0xff] %vm93_vm0, %v5026_v33  ;;  %v3812_v34 = vpop.f32.mrb[69].mxu1 }
 0x41b   :  { %4201 = vst.msk [vmem:[#allocation10 + $0x1a0] sm:$0xff] %vm93_vm0, %v3812_v34 }
 0x41d   :  { %v5033_v35 = vpop.f32.mrb[70].mxu1 }
 0x41e   :  { %4204 = vst.msk [vmem:[#allocation10 + $0x1b8] sm:$0xff] %vm93_vm0, %v5033_v35  ;;  %v3887_v36 = vpop.f32.mrb[71].mxu1 }
 0x41f   :  { %4203 = vst.msk [vmem:[#allocation10 + $0x1b0] sm:$0xff] %vm93_vm0, %v3887_v36 }
 0x421   :  { %v5040_v37 = vpop.f32.mrb[72].mxu1 }
 0x422   :  { %4206 = vst.msk [vmem:[#allocation10 + $0x1c8] sm:$0xff] %vm93_vm0, %v5040_v37  ;;  %v3962_v38 = vpop.f32.mrb[73].mxu1 }
 0x423   :  { %4205 = vst.msk [vmem:[#allocation10 + $0x1c0] sm:$0xff] %vm93_vm0, %v3962_v38 }
 0x425   :  { %v5047_v39 = vpop.f32.mrb[74].mxu1 }
 0x426   :  { %4208 = vst.msk [vmem:[#allocation10 + $0x1d8] sm:$0xff] %vm93_vm0, %v5047_v39  ;;  %v4037_v40 = vpop.f32.mrb[75].mxu1 }
 0x427   :  { %4207 = vst.msk [vmem:[#allocation10 + $0x1d0] sm:$0xff] %vm93_vm0, %v4037_v40 }
 0x429   :  { %v5054_v41 = vpop.f32.mrb[76].mxu1 }
 0x42a   :  { %4210 = vst.msk [vmem:[#allocation10 + $0x1e8] sm:$0xff] %vm93_vm0, %v5054_v41  ;;  %v4112_v42 = vpop.f32.mrb[77].mxu1 }
 0x42b   :  { %4209 = vst.msk [vmem:[#allocation10 + $0x1e0] sm:$0xff] %vm93_vm0, %v4112_v42 }
 0x42d   :  { %v5061_v43 = vpop.f32.mrb[78].mxu1 }
 0x42e   :  { %4212 = vst.msk [vmem:[#allocation10 + $0x1f8] sm:$0xff] %vm93_vm0, %v5061_v43  ;;  %v4187_v44 = vpop.f32.mrb[79].mxu1 }
 0x42f   :  { %4211 = vst.msk [vmem:[#allocation10 + $0x1f0] sm:$0xff] %vm93_vm0, %v4187_v44 }
 0x430   :  { %5348 = shalt.err (!%p5345_p8)
}
 0x431   :  { %s5349_s15 = scalar_lea.hbm %s5892_s4, 8192 }
 0x432   :  { %p5350_p9 = scmp.ne.s32.totalorder %s5892_s4, %s5349_s15  ;;  %p5353_p10 = scmp.lt.u32.totalorder %s5349_s15, %s5892_s4 }
 0x434   :  { %p5355_p11 = pnand %p5353_p10, %p5350_p9 }
 0x436   :  { %5358 = shalt.err (!%p5355_p11)
}
 0x437   :  { %4224 = dma.vmem_to_hbm [thread:$0]  %s4219_s12, 8192, %s5892_s4, [#allocation4], %s5369_s27, %s5369_s27, %s5370_s28  }
 0x438   :  { %5365 = dma.done.wait [#allocation4], 8192  }
 0x439   :  { %5366 = vsyncadd [#allocation4], 4294959104 }
 0x43a   :  { %4228 = vsyncpa [#allocation3], 1 }
 0x43b   :  { %4229 = vsyncpa [#allocation6], 1 }
 0x43c   :  { %4230 = vsyncpa [#allocation9], 1 }
 0x43d   :  { %4231 = vsyncpa [#allocation4], 1 }

</bundles_post_ra>
